<compile_context>
chip_gen: v7x
topology: tpu7x:2x2x1
jax: 0.10.0
libtpu: 0.0.40
codegen_flags: <defaults>
</compile_context>

<pallas_src>
import math
import functools

import jax
import jax.numpy as jnp
from jax import lax
from jax.experimental import pallas as pl
from jax.experimental.pallas import tpu as pltpu


def _self_attention_kernel(num_heads, mxu_dtype,
                           x_ref, w_qkv_ref, w_in_ref, w_out_ref,
                           misc_ref, to_out_w_ref, to_out_b_ref, y_ref):
    """One batch tile: LayerNorm -> to_qkv -> MHA -> to_out -> residual."""
    x = x_ref[...]                                    # (Bt, dim, V) f32
    Bt, dim, V = x.shape
    H = w_qkv_ref.shape[0] // 3                       # hidden_dim == MHA seq len
    hd = V // num_heads                               # head dim
    f32 = jnp.float32
    c = lambda a: a.astype(mxu_dtype)                 # MXU operand dtype only

    # ---- LayerNorm over vector_size (eps=1e-5, biased var); f32 VPU math ----
    mean = jnp.mean(x, axis=-1, keepdims=True)
    var = jnp.mean((x - mean) ** 2, axis=-1, keepdims=True)
    x_norm = (x - mean) * lax.rsqrt(var + 1e-5)
    x_norm = x_norm * misc_ref[0:1, :] + misc_ref[1:2, :]           # (Bt, dim, V)

    # ---- to_qkv: 1x1 Conv1d == per-batch (3H, dim) @ (dim, V) channel matmul.
    # K = dim is tiny; kept as the proven batched einsum (weight pre-cast in
    # the wrapper, broadcast once).
    # TODO(synk): the single (3H, dim) @ (dim, Bt*V) form needs a minor-dim
    # merge reshape that is a Mosaic lowering risk at these sub-(8,128) sizes.
    w_qkv = jnp.broadcast_to(w_qkv_ref[...], (Bt, 3 * H, dim))
    qkv = jnp.einsum('bcd,bdv->bcv', w_qkv, c(x_norm),
                     preferred_element_type=f32)                    # (Bt, 3H, V)
    q = qkv[:, :H, :]
    k = qkv[:, H:2 * H, :]
    v = qkv[:, 2 * H:, :]

    # ---- MHA in-proj: batch tile folded into M -> 2-D (Bt*H, V) @ (V, V)
    # matmuls (no broadcast weights, no per-batch MXU pushes).
    # 1/sqrt(hd) is folded offline into w_in[0] / misc row 2.
    def in_proj(t, idx, b_row):
        t2 = c(t).reshape(Bt * H, V)
        p = jnp.dot(t2, w_in_ref[idx], preferred_element_type=f32)
        return (p + misc_ref[b_row:b_row + 1, :]).reshape(Bt, H, V)

    Q = in_proj(q, 0, 2)                                            # (Bt, H, V)
    K = in_proj(k, 1, 3)
    Vp = in_proj(v, 2, 4)

    # ---- attention: static head loop, score/PV matmuls batched over the batch
    # tile; per-head outputs are concatenated back into lanes so the MHA
    # out-projection is ONE (Bt*H, V) @ (V, V) matmul instead of nh K=hd
    # accumulated matmuls with per-head broadcast weights.
    Qc, Kc, Vc = c(Q), c(K), c(Vp)
    heads = []
    for h in range(num_heads):
        lo = h * hd
        Qh = Qc[:, :, lo:lo + hd]                                   # (Bt, H, hd)
        Kh = Kc[:, :, lo:lo + hd]
        Vh = Vc[:, :, lo:lo + hd]
        S = jnp.einsum('bqe,bke->bqk', Qh, Kh,
                       preferred_element_type=f32)                  # (Bt, H, H)
        S = S - jnp.max(S, axis=-1, keepdims=True)
        P = jnp.exp(S)
        P = P * pl.reciprocal(jnp.sum(P, axis=-1, keepdims=True), approx=False)
        heads.append(jnp.einsum('bqk,bke->bqe', c(P), Vh,
                                preferred_element_type=f32))        # (Bt, H, hd)
    O = jnp.concatenate(heads, axis=-1)                             # (Bt, H, V)

    attn = (jnp.dot(c(O).reshape(Bt * H, V), w_out_ref[...],
                    preferred_element_type=f32)
            + misc_ref[5:6, :]).reshape(Bt, H, V)                   # (Bt, H, V)

    # ---- to_out: 1x1 Conv1d (dim, H) @ (H, V) + bias, then residual ----
    w_to = jnp.broadcast_to(to_out_w_ref[...], (Bt, dim, H))
    h_out = jnp.einsum('bdh,bhv->bdv', w_to, c(attn),
                       preferred_element_type=f32)                  # (Bt, dim, V)
    h_out = h_out + to_out_b_ref[...]                               # (dim,1) bcast
    y_ref[...] = (h_out + x).astype(y_ref.dtype)


def self_attention_forward(x, params, num_heads=4, b_tile=None,
                           mxu_dtype=jnp.float32):
    """x: (B, dim, vector_size) float32.  params: dict from init_params()."""
    B, dim, V = x.shape
    assert V % num_heads == 0
    H = params["w_qkv"].shape[0] // 3
    hd = V // num_heads
    scale = 1.0 / math.sqrt(hd)

    # Batch tiling: big tiles amortize the ~0.35us/grid-step overhead and give
    # every 2-D matmul a large M = b_tile*H.  The 512 cap keeps double-buffered
    # x/y blocks plus f32 intermediates (~12 KiB per batch element) well under
    # ~10 MiB -- safe on v7x's 64 MiB VMEM, trivially so on v5e/v6e's 128 MiB.
    # cdiv(B, 2) keeps >=2 grid steps whenever B >= 2 so v7x can shard the
    # "parallel" batch-tile axis across both TensorCores.
    if b_tile is None:
        b_tile = max(1, min(512, pl.cdiv(B, 2)))
    num_tiles = pl.cdiv(B, b_tile)
    b_pad = num_tiles * b_tile
    x_in = x if b_pad == B else jnp.pad(x, ((0, b_pad - B), (0, 0), (0, 0)))

    # Pack the 14 PyTorch params into 6 slabs (fewer DMA descriptors, less
    # padded VMEM) and pre-cast the MXU operands once in the wrapper.  All
    # biases / LN affine params stay f32 (applied on the VPU in f32).
    w_qkv = params["w_qkv"].astype(mxu_dtype)                        # (3H, dim)
    w_in = jnp.stack([params["wq_t"] * scale, params["wk_t"],
                      params["wv_t"]], axis=0).astype(mxu_dtype)     # (3, V, V)
    w_out = params["wo_t"].astype(mxu_dtype)                         # (V, V)
    misc = jnp.concatenate([params["ln_gamma"], params["ln_beta"],
                            params["bq"] * scale, params["bk"],
                            params["bv"], params["bo"]], axis=0)     # (6, V) f32
    to_out_w = params["to_out_w"].astype(mxu_dtype)                  # (dim, H)
    to_out_b = params["to_out_b"]                                    # (dim, 1) f32

    kernel = functools.partial(_self_attention_kernel, num_heads, mxu_dtype)
    weights = (w_qkv, w_in, w_out, misc, to_out_w, to_out_b)

    def const_spec(a):
        nd = a.ndim
        return pl.BlockSpec(a.shape, lambda i, nd=nd: (0,) * nd)

    y = pl.pallas_call(
        kernel,
        out_shape=jax.ShapeDtypeStruct((b_pad, dim, V), x.dtype),
        grid_spec=pltpu.PrefetchScalarGridSpec(
            num_scalar_prefetch=0,
            grid=(num_tiles,),
            in_specs=[pl.BlockSpec((b_tile, dim, V), lambda i: (i, 0, 0))]
                     + [const_spec(a) for a in weights],
            out_specs=pl.BlockSpec((b_tile, dim, V), lambda i: (i, 0, 0)),
        ),
        compiler_params=pltpu.CompilerParams(
            dimension_semantics=("parallel",),
            vmem_limit_bytes=48 * 1024 * 1024,
        ),
    )(x_in, *weights)
    return y[:B]


def reference_forward(x, params, num_heads=4):
    """Pure-JAX reference mirroring PyTorch SelfAttention.forward semantics."""
    def one(xb):
        V = xb.shape[-1]
        mean = xb.mean(-1, keepdims=True)
        var = ((xb - mean) ** 2).mean(-1, keepdims=True)
        xn = (xb - mean) / jnp.sqrt(var + 1e-5)
        xn = xn * params["ln_gamma"] + params["ln_beta"]
        qkv = params["w_qkv"] @ xn
        H = qkv.shape[0] // 3
        q, k, v = qkv[:H], qkv[H:2 * H], qkv[2 * H:]
        Q = q @ params["wq_t"] + params["bq"]
        K = k @ params["wk_t"] + params["bk"]
        Vp = v @ params["wv_t"] + params["bv"]
        hd = V // num_heads
        outs = []
        for i in range(num_heads):
            s = slice(i * hd, (i + 1) * hd)
            S = (Q[:, s] / math.sqrt(hd)) @ K[:, s].T
            P = jax.nn.softmax(S, axis=-1)
            outs.append(P @ Vp[:, s])
        attn = jnp.concatenate(outs, axis=-1) @ params["wo_t"] + params["bo"]
        h = params["to_out_w"] @ attn + params["to_out_b"]
        return h + xb
    return jax.vmap(one)(x)


def init_params(key, dim, vector_size, hidden_dim):
    V, H = vector_size, hidden_dim
    keys = jax.random.split(key, 8)
    n = lambda k, s: (jax.random.normal(k, s, jnp.float32) * 0.1)
    # PyTorch param shapes: to_qkv.weight (3H, dim, 1); to_out.weight (dim, H, 1),
    # to_out.bias (dim,); MHA in_proj_weight (3V, V), in_proj_bias (3V,),
    # out_proj.weight (V, V), out_proj.bias (V,); LayerNorm weight/bias (V,).
    in_proj_w = n(keys[0], (3 * V, V))
    in_proj_b = n(keys[1], (3 * V,))
    out_proj_w = n(keys[2], (V, V))
    out_proj_b = n(keys[3], (V,))
    params = {
        "ln_gamma": jnp.ones((1, V), jnp.float32),
        "ln_beta": jnp.zeros((1, V), jnp.float32),
        "w_qkv": n(keys[4], (3 * H, dim)),
        "wq_t": in_proj_w[:V].T,
        "wk_t": in_proj_w[V:2 * V].T,
        "wv_t": in_proj_w[2 * V:].T,
        "bq": in_proj_b[:V].reshape(1, V),
        "bk": in_proj_b[V:2 * V].reshape(1, V),
        "bv": in_proj_b[2 * V:].reshape(1, V),
        "wo_t": out_proj_w.T,
        "bo": out_proj_b.reshape(1, V),
        "to_out_w": n(keys[5], (dim, H)),
        "to_out_b": n(keys[6], (dim,)).reshape(dim, 1),
    }
    return params


if __name__ == "__main__":
    B, dim, vector_size, hidden_dim, num_heads = 2, 4, 16, 16, 4

    key = jax.random.PRNGKey(0)
    kx, kp = jax.random.split(key)
    x = jax.random.normal(kx, (B, dim, vector_size), jnp.float32)
    params = init_params(kp, dim, vector_size, hidden_dim)

    y_ref = jax.block_until_ready(reference_forward(x, params, num_heads=num_heads))

    # f32 MXU operands (default): tight correctness check.
    y = jax.block_until_ready(
        self_attention_forward(x, params, num_heads=num_heads))
    assert y.shape == (B, dim, vector_size)
    assert jnp.allclose(y, y_ref, atol=1e-4, rtol=1e-4), "mismatch vs JAX reference"

    # bf16 MXU operands (v6e/v7x fast path; f32 accumulation, f32 VPU math).
    y_bf16 = jax.block_until_ready(
        self_attention_forward(x, params, num_heads=num_heads,
                               mxu_dtype=jnp.bfloat16))
    assert bool(jnp.all(jnp.isfinite(y_bf16)))
    assert jnp.allclose(y_bf16, y_ref, atol=1e-1, rtol=1e-1), "bf16 path mismatch"

    print("KERNEL_OK")
</pallas_src>

<mosaic_0001>
module attributes {stable_mosaic.version = 11 : i64} {
  func.func @_self_attention_kernel(%arg0: i32, %arg1: memref<1x4x16xf32, #tpu.memory_space<vmem>>, %arg2: memref<48x4xf32, #tpu.memory_space<vmem>>, %arg3: memref<3x16x16xf32, #tpu.memory_space<vmem>>, %arg4: memref<16x16xf32, #tpu.memory_space<vmem>>, %arg5: memref<6x16xf32, #tpu.memory_space<vmem>>, %arg6: memref<4x16xf32, #tpu.memory_space<vmem>>, %arg7: memref<4x1xf32, #tpu.memory_space<vmem>>, %arg8: memref<1x4x16xf32, #tpu.memory_space<vmem>>) attributes {dimension_semantics = [#tpu.dimension_semantics<parallel>], iteration_bounds = array<i64: 2>, scalar_prefetch = 0 : i64, scratch_operands = 0 : i64, tpu.core_type = #tpu.core_type<tc>, window_params = [{transform_indices = @transform_0, window_bounds = array<i64: 1, 4, 16>}, {pipeline_mode = #tpu.pipeline_mode<synchronous>, transform_indices = @transform_1, window_bounds = array<i64: 48, 4>}, {pipeline_mode = #tpu.pipeline_mode<synchronous>, transform_indices = @transform_2, window_bounds = array<i64: 3, 16, 16>}, {pipeline_mode = #tpu.pipeline_mode<synchronous>, transform_indices = @transform_3, window_bounds = array<i64: 16, 16>}, {pipeline_mode = #tpu.pipeline_mode<synchronous>, transform_indices = @transform_4, window_bounds = array<i64: 6, 16>}, {pipeline_mode = #tpu.pipeline_mode<synchronous>, transform_indices = @transform_5, window_bounds = array<i64: 4, 16>}, {pipeline_mode = #tpu.pipeline_mode<synchronous>, transform_indices = @transform_6, window_bounds = array<i64: 4, 1>}, {transform_indices = @transform_7, window_bounds = array<i64: 1, 4, 16>}]} {
    %c0 = arith.constant 0 : index
    %c0_0 = arith.constant 0 : index
    %c0_1 = arith.constant 0 : index
    %0 = vector.load %arg1[%c0, %c0_0, %c0_1] : memref<1x4x16xf32, #tpu.memory_space<vmem>>, vector<1x4x16xf32>
    %cst = arith.constant dense<0.000000e+00> : vector<1x4xf32>
    %1 = vector.multi_reduction <add>, %0, %cst [2] : vector<1x4x16xf32> to vector<1x4xf32>
    %2 = vector.shape_cast %1 : vector<1x4xf32> to vector<1x4x1xf32>
    %cst_2 = arith.constant 1.600000e+01 : f32
    %3 = vector.broadcast %cst_2 : f32 to vector<1x4x1xf32>
    %4 = arith.divf %2, %3 : vector<1x4x1xf32>
    %5 = vector.broadcast %4 : vector<1x4x1xf32> to vector<1x4x16xf32>
    %6 = arith.subf %0, %5 : vector<1x4x16xf32>
    %7 = arith.mulf %6, %6 : vector<1x4x16xf32>
    %cst_3 = arith.constant dense<0.000000e+00> : vector<1x4xf32>
    %8 = vector.multi_reduction <add>, %7, %cst_3 [2] : vector<1x4x16xf32> to vector<1x4xf32>
    %9 = vector.shape_cast %8 : vector<1x4xf32> to vector<1x4x1xf32>
    %cst_4 = arith.constant 1.600000e+01 : f32
    %10 = vector.broadcast %cst_4 : f32 to vector<1x4x1xf32>
    %11 = arith.divf %9, %10 : vector<1x4x1xf32>
    %12 = vector.broadcast %4 : vector<1x4x1xf32> to vector<1x4x16xf32>
    %13 = arith.subf %0, %12 : vector<1x4x16xf32>
    %cst_5 = arith.constant 9.99999974E-6 : f32
    %14 = vector.broadcast %cst_5 : f32 to vector<1x4x1xf32>
    %15 = arith.addf %11, %14 : vector<1x4x1xf32>
    %16 = math.rsqrt %15 : vector<1x4x1xf32>
    %17 = vector.broadcast %16 : vector<1x4x1xf32> to vector<1x4x16xf32>
    %18 = arith.mulf %13, %17 : vector<1x4x16xf32>
    %c0_6 = arith.constant 0 : index
    %c0_7 = arith.constant 0 : index
    %19 = vector.load %arg5[%c0_6, %c0_7] : memref<6x16xf32, #tpu.memory_space<vmem>>, vector<1x16xf32>
    %20 = vector.shape_cast %19 : vector<1x16xf32> to vector<1x1x16xf32>
    %21 = vector.broadcast %20 : vector<1x1x16xf32> to vector<1x4x16xf32>
    %22 = arith.mulf %18, %21 : vector<1x4x16xf32>
    %c1 = arith.constant 1 : index
    %c0_8 = arith.constant 0 : index
    %23 = vector.load %arg5[%c1, %c0_8] : memref<6x16xf32, #tpu.memory_space<vmem>>, vector<1x16xf32>
    %24 = vector.shape_cast %23 : vector<1x16xf32> to vector<1x1x16xf32>
    %25 = vector.broadcast %24 : vector<1x1x16xf32> to vector<1x4x16xf32>
    %26 = arith.addf %22, %25 : vector<1x4x16xf32>
    %c0_9 = arith.constant 0 : index
    %c0_10 = arith.constant 0 : index
    %27 = vector.load %arg2[%c0_9, %c0_10] : memref<48x4xf32, #tpu.memory_space<vmem>>, vector<48x4xf32>
    %28 = vector.shape_cast %27 : vector<48x4xf32> to vector<1x48x4xf32>
    "tpu.trace_start"() <{level = 10 : i32, message = "bcd,bdv->bcv"}> : () -> ()
    %cst_11 = arith.constant dense<0.000000e+00> : vector<1x48x16xf32>
    %29 = tpu.matmul %28, %26, %cst_11 {dimension_numbers = #tpu.dot_dimension_numbers<[2], [1], [1], [2], [0, 0, 0, 1, 1, 2], [0], [0]>} : vector<1x48x4xf32>, vector<1x4x16xf32>, vector<1x48x16xf32> -> vector<1x48x16xf32>
    "tpu.trace_stop"() : () -> ()
    %30 = vector.extract_strided_slice %29 {offsets = [0, 0, 0], sizes = [1, 16, 16], strides = [1, 1, 1]} : vector<1x48x16xf32> to vector<1x16x16xf32>
    %31 = vector.extract_strided_slice %29 {offsets = [0, 16, 0], sizes = [1, 16, 16], strides = [1, 1, 1]} : vector<1x48x16xf32> to vector<1x16x16xf32>
    %32 = vector.extract_strided_slice %29 {offsets = [0, 32, 0], sizes = [1, 16, 16], strides = [1, 1, 1]} : vector<1x48x16xf32> to vector<1x16x16xf32>
    %33 = vector.shape_cast %30 : vector<1x16x16xf32> to vector<16x16xf32>
    %c0_12 = arith.constant 0 : index
    %c0_13 = arith.constant 0 : index
    %c0_14 = arith.constant 0 : index
    %34 = vector.load %arg3[%c0_12, %c0_13, %c0_14] : memref<3x16x16xf32, #tpu.memory_space<vmem>>, vector<1x16x16xf32>
    %35 = vector.shape_cast %34 : vector<1x16x16xf32> to vector<16x16xf32>
    %cst_15 = arith.constant dense<0.000000e+00> : vector<16x16xf32>
    %36 = tpu.matmul %33, %35, %cst_15 {dimension_numbers = #tpu.dot_dimension_numbers<[1], [0], [0], [1], [0, 0, 1, 1], [], []>} : vector<16x16xf32>, vector<16x16xf32>, vector<16x16xf32> -> vector<16x16xf32>
    %c2 = arith.constant 2 : index
    %c0_16 = arith.constant 0 : index
    %37 = vector.load %arg5[%c2, %c0_16] : memref<6x16xf32, #tpu.memory_space<vmem>>, vector<1x16xf32>
    %38 = vector.broadcast %37 : vector<1x16xf32> to vector<16x16xf32>
    %39 = arith.addf %36, %38 : vector<16x16xf32>
    %40 = vector.shape_cast %39 : vector<16x16xf32> to vector<1x16x16xf32>
    %41 = vector.shape_cast %31 : vector<1x16x16xf32> to vector<16x16xf32>
    %c1_17 = arith.constant 1 : index
    %c0_18 = arith.constant 0 : index
    %c0_19 = arith.constant 0 : index
    %42 = vector.load %arg3[%c1_17, %c0_18, %c0_19] : memref<3x16x16xf32, #tpu.memory_space<vmem>>, vector<1x16x16xf32>
    %43 = vector.shape_cast %42 : vector<1x16x16xf32> to vector<16x16xf32>
    %cst_20 = arith.constant dense<0.000000e+00> : vector<16x16xf32>
    %44 = tpu.matmul %41, %43, %cst_20 {dimension_numbers = #tpu.dot_dimension_numbers<[1], [0], [0], [1], [0, 0, 1, 1], [], []>} : vector<16x16xf32>, vector<16x16xf32>, vector<16x16xf32> -> vector<16x16xf32>
    %c3 = arith.constant 3 : index
    %c0_21 = arith.constant 0 : index
    %45 = vector.load %arg5[%c3, %c0_21] : memref<6x16xf32, #tpu.memory_space<vmem>>, vector<1x16xf32>
    %46 = vector.broadcast %45 : vector<1x16xf32> to vector<16x16xf32>
    %47 = arith.addf %44, %46 : vector<16x16xf32>
    %48 = vector.shape_cast %47 : vector<16x16xf32> to vector<1x16x16xf32>
    %49 = vector.shape_cast %32 : vector<1x16x16xf32> to vector<16x16xf32>
    %c2_22 = arith.constant 2 : index
    %c0_23 = arith.constant 0 : index
    %c0_24 = arith.constant 0 : index
    %50 = vector.load %arg3[%c2_22, %c0_23, %c0_24] : memref<3x16x16xf32, #tpu.memory_space<vmem>>, vector<1x16x16xf32>
    %51 = vector.shape_cast %50 : vector<1x16x16xf32> to vector<16x16xf32>
    %cst_25 = arith.constant dense<0.000000e+00> : vector<16x16xf32>
    %52 = tpu.matmul %49, %51, %cst_25 {dimension_numbers = #tpu.dot_dimension_numbers<[1], [0], [0], [1], [0, 0, 1, 1], [], []>} : vector<16x16xf32>, vector<16x16xf32>, vector<16x16xf32> -> vector<16x16xf32>
    %c4 = arith.constant 4 : index
    %c0_26 = arith.constant 0 : index
    %53 = vector.load %arg5[%c4, %c0_26] : memref<6x16xf32, #tpu.memory_space<vmem>>, vector<1x16xf32>
    %54 = vector.broadcast %53 : vector<1x16xf32> to vector<16x16xf32>
    %55 = arith.addf %52, %54 : vector<16x16xf32>
    %56 = vector.shape_cast %55 : vector<16x16xf32> to vector<1x16x16xf32>
    %57 = vector.extract_strided_slice %40 {offsets = [0, 0, 0], sizes = [1, 16, 4], strides = [1, 1, 1]} : vector<1x16x16xf32> to vector<1x16x4xf32>
    %58 = vector.extract_strided_slice %48 {offsets = [0, 0, 0], sizes = [1, 16, 4], strides = [1, 1, 1]} : vector<1x16x16xf32> to vector<1x16x4xf32>
    %59 = vector.extract_strided_slice %56 {offsets = [0, 0, 0], sizes = [1, 16, 4], strides = [1, 1, 1]} : vector<1x16x16xf32> to vector<1x16x4xf32>
    "tpu.trace_start"() <{level = 10 : i32, message = "bqe,bke->bqk"}> : () -> ()
    %cst_27 = arith.constant dense<0.000000e+00> : vector<1x16x16xf32>
    %60 = tpu.matmul %57, %58, %cst_27 {dimension_numbers = #tpu.dot_dimension_numbers<[2], [2], [1], [1], [0, 0, 0, 1, 1, 1], [0], [0]>} : vector<1x16x4xf32>, vector<1x16x4xf32>, vector<1x16x16xf32> -> vector<1x16x16xf32>
    "tpu.trace_stop"() : () -> ()
    %cst_28 = arith.constant dense<0xFF800000> : vector<1x16xf32>
    %61 = vector.multi_reduction <maximumf>, %60, %cst_28 [2] : vector<1x16x16xf32> to vector<1x16xf32>
    %62 = vector.shape_cast %61 : vector<1x16xf32> to vector<1x16x1xf32>
    %63 = vector.broadcast %62 : vector<1x16x1xf32> to vector<1x16x16xf32>
    %64 = arith.subf %60, %63 : vector<1x16x16xf32>
    %65 = math.exp %64 : vector<1x16x16xf32>
    %cst_29 = arith.constant dense<0.000000e+00> : vector<1x16xf32>
    %66 = vector.multi_reduction <add>, %65, %cst_29 [2] : vector<1x16x16xf32> to vector<1x16xf32>
    %67 = vector.shape_cast %66 : vector<1x16xf32> to vector<1x16x1xf32>
    %68 = tpu.reciprocal %67 : vector<1x16x1xf32> -> vector<1x16x1xf32>
    %69 = vector.broadcast %68 : vector<1x16x1xf32> to vector<1x16x16xf32>
    %70 = arith.mulf %65, %69 : vector<1x16x16xf32>
    "tpu.trace_start"() <{level = 10 : i32, message = "bqk,bke->bqe"}> : () -> ()
    %cst_30 = arith.constant dense<0.000000e+00> : vector<1x16x4xf32>
    %71 = tpu.matmul %70, %59, %cst_30 {dimension_numbers = #tpu.dot_dimension_numbers<[2], [1], [1], [2], [0, 0, 0, 1, 1, 2], [0], [0]>} : vector<1x16x16xf32>, vector<1x16x4xf32>, vector<1x16x4xf32> -> vector<1x16x4xf32>
    "tpu.trace_stop"() : () -> ()
    %72 = vector.extract_strided_slice %40 {offsets = [0, 0, 4], sizes = [1, 16, 4], strides = [1, 1, 1]} : vector<1x16x16xf32> to vector<1x16x4xf32>
    %73 = vector.extract_strided_slice %48 {offsets = [0, 0, 4], sizes = [1, 16, 4], strides = [1, 1, 1]} : vector<1x16x16xf32> to vector<1x16x4xf32>
    %74 = vector.extract_strided_slice %56 {offsets = [0, 0, 4], sizes = [1, 16, 4], strides = [1, 1, 1]} : vector<1x16x16xf32> to vector<1x16x4xf32>
    "tpu.trace_start"() <{level = 10 : i32, message = "bqe,bke->bqk"}> : () -> ()
    %cst_31 = arith.constant dense<0.000000e+00> : vector<1x16x16xf32>
    %75 = tpu.matmul %72, %73, %cst_31 {dimension_numbers = #tpu.dot_dimension_numbers<[2], [2], [1], [1], [0, 0, 0, 1, 1, 1], [0], [0]>} : vector<1x16x4xf32>, vector<1x16x4xf32>, vector<1x16x16xf32> -> vector<1x16x16xf32>
    "tpu.trace_stop"() : () -> ()
    %cst_32 = arith.constant dense<0xFF800000> : vector<1x16xf32>
    %76 = vector.multi_reduction <maximumf>, %75, %cst_32 [2] : vector<1x16x16xf32> to vector<1x16xf32>
    %77 = vector.shape_cast %76 : vector<1x16xf32> to vector<1x16x1xf32>
    %78 = vector.broadcast %77 : vector<1x16x1xf32> to vector<1x16x16xf32>
    %79 = arith.subf %75, %78 : vector<1x16x16xf32>
    %80 = math.exp %79 : vector<1x16x16xf32>
    %cst_33 = arith.constant dense<0.000000e+00> : vector<1x16xf32>
    %81 = vector.multi_reduction <add>, %80, %cst_33 [2] : vector<1x16x16xf32> to vector<1x16xf32>
    %82 = vector.shape_cast %81 : vector<1x16xf32> to vector<1x16x1xf32>
    %83 = tpu.reciprocal %82 : vector<1x16x1xf32> -> vector<1x16x1xf32>
    %84 = vector.broadcast %83 : vector<1x16x1xf32> to vector<1x16x16xf32>
    %85 = arith.mulf %80, %84 : vector<1x16x16xf32>
    "tpu.trace_start"() <{level = 10 : i32, message = "bqk,bke->bqe"}> : () -> ()
    %cst_34 = arith.constant dense<0.000000e+00> : vector<1x16x4xf32>
    %86 = tpu.matmul %85, %74, %cst_34 {dimension_numbers = #tpu.dot_dimension_numbers<[2], [1], [1], [2], [0, 0, 0, 1, 1, 2], [0], [0]>} : vector<1x16x16xf32>, vector<1x16x4xf32>, vector<1x16x4xf32> -> vector<1x16x4xf32>
    "tpu.trace_stop"() : () -> ()
    %87 = vector.extract_strided_slice %40 {offsets = [0, 0, 8], sizes = [1, 16, 4], strides = [1, 1, 1]} : vector<1x16x16xf32> to vector<1x16x4xf32>
    %88 = vector.extract_strided_slice %48 {offsets = [0, 0, 8], sizes = [1, 16, 4], strides = [1, 1, 1]} : vector<1x16x16xf32> to vector<1x16x4xf32>
    %89 = vector.extract_strided_slice %56 {offsets = [0, 0, 8], sizes = [1, 16, 4], strides = [1, 1, 1]} : vector<1x16x16xf32> to vector<1x16x4xf32>
    "tpu.trace_start"() <{level = 10 : i32, message = "bqe,bke->bqk"}> : () -> ()
    %cst_35 = arith.constant dense<0.000000e+00> : vector<1x16x16xf32>
    %90 = tpu.matmul %87, %88, %cst_35 {dimension_numbers = #tpu.dot_dimension_numbers<[2], [2], [1], [1], [0, 0, 0, 1, 1, 1], [0], [0]>} : vector<1x16x4xf32>, vector<1x16x4xf32>, vector<1x16x16xf32> -> vector<1x16x16xf32>
    "tpu.trace_stop"() : () -> ()
    %cst_36 = arith.constant dense<0xFF800000> : vector<1x16xf32>
    %91 = vector.multi_reduction <maximumf>, %90, %cst_36 [2] : vector<1x16x16xf32> to vector<1x16xf32>
    %92 = vector.shape_cast %91 : vector<1x16xf32> to vector<1x16x1xf32>
    %93 = vector.broadcast %92 : vector<1x16x1xf32> to vector<1x16x16xf32>
    %94 = arith.subf %90, %93 : vector<1x16x16xf32>
    %95 = math.exp %94 : vector<1x16x16xf32>
    %cst_37 = arith.constant dense<0.000000e+00> : vector<1x16xf32>
    %96 = vector.multi_reduction <add>, %95, %cst_37 [2] : vector<1x16x16xf32> to vector<1x16xf32>
    %97 = vector.shape_cast %96 : vector<1x16xf32> to vector<1x16x1xf32>
    %98 = tpu.reciprocal %97 : vector<1x16x1xf32> -> vector<1x16x1xf32>
    %99 = vector.broadcast %98 : vector<1x16x1xf32> to vector<1x16x16xf32>
    %100 = arith.mulf %95, %99 : vector<1x16x16xf32>
    "tpu.trace_start"() <{level = 10 : i32, message = "bqk,bke->bqe"}> : () -> ()
    %cst_38 = arith.constant dense<0.000000e+00> : vector<1x16x4xf32>
    %101 = tpu.matmul %100, %89, %cst_38 {dimension_numbers = #tpu.dot_dimension_numbers<[2], [1], [1], [2], [0, 0, 0, 1, 1, 2], [0], [0]>} : vector<1x16x16xf32>, vector<1x16x4xf32>, vector<1x16x4xf32> -> vector<1x16x4xf32>
    "tpu.trace_stop"() : () -> ()
    %102 = vector.extract_strided_slice %40 {offsets = [0, 0, 12], sizes = [1, 16, 4], strides = [1, 1, 1]} : vector<1x16x16xf32> to vector<1x16x4xf32>
    %103 = vector.extract_strided_slice %48 {offsets = [0, 0, 12], sizes = [1, 16, 4], strides = [1, 1, 1]} : vector<1x16x16xf32> to vector<1x16x4xf32>
    %104 = vector.extract_strided_slice %56 {offsets = [0, 0, 12], sizes = [1, 16, 4], strides = [1, 1, 1]} : vector<1x16x16xf32> to vector<1x16x4xf32>
    "tpu.trace_start"() <{level = 10 : i32, message = "bqe,bke->bqk"}> : () -> ()
    %cst_39 = arith.constant dense<0.000000e+00> : vector<1x16x16xf32>
    %105 = tpu.matmul %102, %103, %cst_39 {dimension_numbers = #tpu.dot_dimension_numbers<[2], [2], [1], [1], [0, 0, 0, 1, 1, 1], [0], [0]>} : vector<1x16x4xf32>, vector<1x16x4xf32>, vector<1x16x16xf32> -> vector<1x16x16xf32>
    "tpu.trace_stop"() : () -> ()
    %cst_40 = arith.constant dense<0xFF800000> : vector<1x16xf32>
    %106 = vector.multi_reduction <maximumf>, %105, %cst_40 [2] : vector<1x16x16xf32> to vector<1x16xf32>
    %107 = vector.shape_cast %106 : vector<1x16xf32> to vector<1x16x1xf32>
    %108 = vector.broadcast %107 : vector<1x16x1xf32> to vector<1x16x16xf32>
    %109 = arith.subf %105, %108 : vector<1x16x16xf32>
    %110 = math.exp %109 : vector<1x16x16xf32>
    %cst_41 = arith.constant dense<0.000000e+00> : vector<1x16xf32>
    %111 = vector.multi_reduction <add>, %110, %cst_41 [2] : vector<1x16x16xf32> to vector<1x16xf32>
    %112 = vector.shape_cast %111 : vector<1x16xf32> to vector<1x16x1xf32>
    %113 = tpu.reciprocal %112 : vector<1x16x1xf32> -> vector<1x16x1xf32>
    %114 = vector.broadcast %113 : vector<1x16x1xf32> to vector<1x16x16xf32>
    %115 = arith.mulf %110, %114 : vector<1x16x16xf32>
    "tpu.trace_start"() <{level = 10 : i32, message = "bqk,bke->bqe"}> : () -> ()
    %cst_42 = arith.constant dense<0.000000e+00> : vector<1x16x4xf32>
    %116 = tpu.matmul %115, %104, %cst_42 {dimension_numbers = #tpu.dot_dimension_numbers<[2], [1], [1], [2], [0, 0, 0, 1, 1, 2], [0], [0]>} : vector<1x16x16xf32>, vector<1x16x4xf32>, vector<1x16x4xf32> -> vector<1x16x4xf32>
    "tpu.trace_stop"() : () -> ()
    %117 = tpu.concatenate %71, %86, %101, %116 in 2 : vector<1x16x4xf32>, vector<1x16x4xf32>, vector<1x16x4xf32>, vector<1x16x4xf32> -> vector<1x16x16xf32>
    %118 = vector.shape_cast %117 : vector<1x16x16xf32> to vector<16x16xf32>
    %c0_43 = arith.constant 0 : index
    %c0_44 = arith.constant 0 : index
    %119 = vector.load %arg4[%c0_43, %c0_44] : memref<16x16xf32, #tpu.memory_space<vmem>>, vector<16x16xf32>
    %cst_45 = arith.constant dense<0.000000e+00> : vector<16x16xf32>
    %120 = tpu.matmul %118, %119, %cst_45 {dimension_numbers = #tpu.dot_dimension_numbers<[1], [0], [0], [1], [0, 0, 1, 1], [], []>} : vector<16x16xf32>, vector<16x16xf32>, vector<16x16xf32> -> vector<16x16xf32>
    %c5 = arith.constant 5 : index
    %c0_46 = arith.constant 0 : index
    %121 = vector.load %arg5[%c5, %c0_46] : memref<6x16xf32, #tpu.memory_space<vmem>>, vector<1x16xf32>
    %122 = vector.broadcast %121 : vector<1x16xf32> to vector<16x16xf32>
    %123 = arith.addf %120, %122 : vector<16x16xf32>
    %124 = vector.shape_cast %123 : vector<16x16xf32> to vector<1x16x16xf32>
    %c0_47 = arith.constant 0 : index
    %c0_48 = arith.constant 0 : index
    %125 = vector.load %arg6[%c0_47, %c0_48] : memref<4x16xf32, #tpu.memory_space<vmem>>, vector<4x16xf32>
    %126 = vector.shape_cast %125 : vector<4x16xf32> to vector<1x4x16xf32>
    "tpu.trace_start"() <{level = 10 : i32, message = "bdh,bhv->bdv"}> : () -> ()
    %cst_49 = arith.constant dense<0.000000e+00> : vector<1x4x16xf32>
    %127 = tpu.matmul %126, %124, %cst_49 {dimension_numbers = #tpu.dot_dimension_numbers<[2], [1], [1], [2], [0, 0, 0, 1, 1, 2], [0], [0]>} : vector<1x4x16xf32>, vector<1x16x16xf32>, vector<1x4x16xf32> -> vector<1x4x16xf32>
    "tpu.trace_stop"() : () -> ()
    %c0_50 = arith.constant 0 : index
    %c0_51 = arith.constant 0 : index
    %128 = vector.load %arg7[%c0_50, %c0_51] : memref<4x1xf32, #tpu.memory_space<vmem>>, vector<4x1xf32>
    %129 = vector.shape_cast %128 : vector<4x1xf32> to vector<1x4x1xf32>
    %130 = vector.broadcast %129 : vector<1x4x1xf32> to vector<1x4x16xf32>
    %131 = arith.addf %127, %130 : vector<1x4x16xf32>
    %132 = arith.addf %131, %0 : vector<1x4x16xf32>
    %c0_52 = arith.constant 0 : index
    %c0_53 = arith.constant 0 : index
    %c0_54 = arith.constant 0 : index
    %133 = vector.load %arg8[%c0_52, %c0_53, %c0_54] : memref<1x4x16xf32, #tpu.memory_space<vmem>>, vector<1x4x16xf32>
    tpu.vector_store %arg8[%c0_52, %c0_53, %c0_54], %132 {strides = array<i32>} : memref<1x4x16xf32, #tpu.memory_space<vmem>>, vector<1x4x16xf32>,
    return
  }
  func.func @transform_0(%arg0: i32) -> (i32, i32, i32) {
    %c0_i32 = arith.constant 0 : i32
    %c0_i32_0 = arith.constant 0 : i32
    %c0_i32_1 = arith.constant 0 : i32
    return %arg0, %c0_i32, %c0_i32_0 : i32, i32, i32
  }
  func.func @transform_1(%arg0: i32) -> (i32, i32) {
    %c0_i32 = arith.constant 0 : i32
    %c0_i32_0 = arith.constant 0 : i32
    %c0_i32_1 = arith.constant 0 : i32
    return %c0_i32, %c0_i32_0 : i32, i32
  }
  func.func @transform_2(%arg0: i32) -> (i32, i32, i32) {
    %c0_i32 = arith.constant 0 : i32
    %c0_i32_0 = arith.constant 0 : i32
    %c0_i32_1 = arith.constant 0 : i32
    %c0_i32_2 = arith.constant 0 : i32
    return %c0_i32, %c0_i32_0, %c0_i32_1 : i32, i32, i32
  }
  func.func @transform_3(%arg0: i32) -> (i32, i32) {
    %c0_i32 = arith.constant 0 : i32
    %c0_i32_0 = arith.constant 0 : i32
    %c0_i32_1 = arith.constant 0 : i32
    return %c0_i32, %c0_i32_0 : i32, i32
  }
  func.func @transform_4(%arg0: i32) -> (i32, i32) {
    %c0_i32 = arith.constant 0 : i32
    %c0_i32_0 = arith.constant 0 : i32
    %c0_i32_1 = arith.constant 0 : i32
    return %c0_i32, %c0_i32_0 : i32, i32
  }
  func.func @transform_5(%arg0: i32) -> (i32, i32) {
    %c0_i32 = arith.constant 0 : i32
    %c0_i32_0 = arith.constant 0 : i32
    %c0_i32_1 = arith.constant 0 : i32
    return %c0_i32, %c0_i32_0 : i32, i32
  }
  func.func @transform_6(%arg0: i32) -> (i32, i32) {
    %c0_i32 = arith.constant 0 : i32
    %c0_i32_0 = arith.constant 0 : i32
    %c0_i32_1 = arith.constant 0 : i32
    return %c0_i32, %c0_i32_0 : i32, i32
  }
  func.func @transform_7(%arg0: i32) -> (i32, i32, i32) {
    %c0_i32 = arith.constant 0 : i32
    %c0_i32_0 = arith.constant 0 : i32
    %c0_i32_1 = arith.constant 0 : i32
    return %arg0, %c0_i32, %c0_i32_0 : i32, i32, i32
  }
}

</mosaic_0001>

<bundles_post_ra>
// kernel: tpu_custom_call.1
= control target key start
LH: loop header
LB: loop body
LE: loop exit
PB: predicated region body
PF: predicated region fallthrough
CT: control target
= control target key end

     0   :  { %12 = vsyncpa [#allocation3], 0  ;;  %s2803_s0 = inlined_call_operand.hbm [shape: f32[2,4,16], index: 0, kind: input, shape index: {}]   ;;  %s2804_s1 = inlined_call_operand.vmem [shape: f32[48,4], index: 1, kind: input, shape index: {}]   ;;  %s2805_s2 = inlined_call_operand.vmem [shape: f32[3,16,16], index: 2, kind: input, shape index: {}]   ;;  %s2806_s3 = inlined_call_operand.vmem [shape: f32[16,16], index: 3, kind: input, shape index: {}]   ;;  %s2807_s4 = inlined_call_operand.vmem [shape: f32[6,16], index: 4, kind: input, shape index: {}]   ;;  %s2808_s5 = inlined_call_operand.hbm [shape: f32[4,16], index: 5, kind: input, shape index: {}]   ;;  %s2809_s6 = inlined_call_operand.vmem [shape: f32[4,1], index: 6, kind: input, shape index: {}]   ;;  %s2810_s7 = inlined_call_operand.hbm [shape: f32[2,4,16], index: 7, kind: output, shape index: {}]  }
   0x1   :  { %14 = vsyncpa [#allocation3 + $0x1], 0 }
   0x2   :  { %15 = vsyncpa [#allocation6], 0 }
   0x3   :  { %16 = vsyncpa [#allocation4], 0 }
   0x4   :  { %18 = vsyncpa [#allocation4 + $0x1], 0  ;;  %s2413_s24 = smov 0   ;;  %s2415_s25 = smov 0  }
   0x5   :  { %s2417_s26 = smov 0   ;;  %s2419_s27 = smov 0  }
   0x6 LB: > { %s2434_s28 = sadd.s32 4294967295, %s2358_s27   ;;  %s1814_s29 = sadd.s32 4294967294, %s2358_s27   ;;  %s2358_s27 = sphi %s2419_s27, %s2836_s27   ;;  %s2354_s26 = sphi %s2417_s26, %s2835_s26   ;;  %s2350_s25 = sphi %s2415_s25, %s2834_s25   ;;  %s2346_s24 = sphi %s2413_s24, %s2833_s24  }
   0x7   : > { %p44_p0 = scmp.ne.s32.totalorder %s2350_s25, %s2346_s24  ;;  %p2811_p1 = scmp.eq.s32.totalorder %s2434_s28, 0 }
   0x8   : > { %p200_p3 = scmp.eq.s32.totalorder %s1814_s29, 1  ;;  %p1815_p5 = scmp.ge.s32.totalorder %s2358_s27, 1 }
   0x9   : > { %p2443_p4 = por %p2811_p1, %p44_p0  ;;  %p207_p7 = scmp.lt.s32.totalorder %s2358_s27, 3 }
   0xa   : > { %p2448_p6 = por %p200_p3, %p44_p0  ;;  %s2360_s10 = smov [#allocation5]  }
   0xb   : > { %s2814_s30 = scalar_select %p2443_p4, 1, 0 }
   0xc   : > { %s2815_s8 = scalar_select %p2448_p6, 1, 0 }
   0xd   : > { %p2453_p8 = pnand %p1815_p5, %p207_p7  ;;  %s232_s11 = sshll.u32 %s2360_s10, 4  ;;  %s233_s11 = int_to_ptr.vmem [resolvable:$true] %s232_s11 }
   0xe   : > { %s2461_s12 = sadd.s32 1, %s2358_s27   ;;  %s31_s16 = sadd.s32 1, %s2354_s26 }
   0xf   : > { %s2816_s9 = scalar_select %p2453_p8, 1, 0 }
  0x10   : > { %p2105_p10 = pneg %p2453_p8  ;;  %s28_s14 = ssub.s32 %s2358_s27, %s2461_s12 }
  0x11   : > { %p2471_p12 = scmp.eq.s32.totalorder %s28_s14, 0  ;;  %s2230_s19 = scalar_lea.hbm %s2808_s5, 64 }
  0x12   : > { %p2465_p11 = pnand %p2105_p10, %p2811_p1  ;;  %p2231_p0 = scmp.ne.s32.totalorder %s2808_s5, %s2230_s19 }
  0x13   : > { %s2818_s15 = scalar_select %p2471_p12, 1, 0 }
  0x14   : > { %p2232_p3 = pneg %p2465_p11  ;;  %p2237_p10 = scmp.lt.u32.totalorder %s2230_s19, %s2808_s5 }
  0x16   : > { %p2233_p5 = pnand %p2232_p3, %p2231_p0 }
  0x18   : > { %p2234_p7 = pneg %p2233_p5 }
  0x1a   : > { %p2239_p9 = pnand %p2237_p10, %p2234_p7 }
  0x1c   : > { %2242 = shalt.err (!%p2239_p9)
}
  0x1d   : > { %s2243_s29 = scalar_lea.vmem %s233_s11, 64  ;;  %p2251_p6 = scmp.lt.s32.totalorder %s233_s11, %s233_s11 }
  0x1e   : > { %p2244_p1 = scmp.ne.s32.totalorder %s233_s11, %s2243_s29  ;;  %p2252_p4 = scmp.lt.s32.totalorder %s2243_s29, %s2243_s29 }
  0x20   : > { %p2246_p2 = pnand %p2244_p1, %p2232_p3  ;;  %p2253_p8 = por %p2252_p4, %p2251_p6 }
  0x22   : > { %p2247_p13 = pneg %p2246_p2 }
  0x24   : > { %p2254_p12 = pnand %p2253_p8, %p2247_p13 }
  0x26   : > { %2257 = shalt.err (!%p2254_p12)
}
  0x27   : > { %2108 = dma.hbm_to_vmem [thread:$0]  (!%p2465_p11), %s2808_s5, 64, %s233_s11, [#allocation6]  }
  0x28   : > { %p2819_p1 = scmp.ne.s32.totalorder %s2818_s15, 0  ;;  %p39_p2 = scmp.eq.s32.totalorder %s2358_s27, 0 }
  0x29   : > { %p2820_p4 = scmp.ne.s32.totalorder %s2354_s26, %s2350_s25  ;;  %p2821_p6 = scmp.eq.s32.totalorder %s2434_s28, 1 }
  0x2a   : > { %s2497_s17 = scalar_select %p2819_p1, %s2354_s26, %s31_s16  }
  0x2b   : > { %p2505_p8 = por %p2821_p6, %p2820_p4  ;;  %p2118_p9 = scmp.lt.s32.totalorder %s2358_s27, 2 }
  0x2c   : > { %s246_s18 = sand.u32 1, %s2354_s26   ;;  %p2823_p12 = pmov %p2820_p4 }
  0x2d   : > { %s1818_s19 = sshll.u32 %s246_s18, 2  ;;  %s1819_s20 = sshll.u32 %s2358_s27, 6 }
  0x2e   : > { %p40_p13 = por %p39_p2, %p2823_p12  ;;  %s2518_s11 = scalar_lea.hbm %s2803_s0, %s1819_s20 }
  0x2f   : > { %s250_s15 = scalar_lea.vmem [#allocation2], %s1818_s19  ;;  %s247_s29 = scalar_lea.sflag [#allocation3], %s246_s18 }
  0x30   : > { %s257_s16 = sshll.u32 %s250_s15, 4  ;;  %p2520_p11 = pnand %p2118_p9, %p40_p13  ;;  %s2524_s16 = int_to_ptr.vmem [resolvable:$true] %s257_s16 }
  0x31   : > { %s2258_s10 = scalar_lea.hbm %s2518_s11, 64  ;;  %s2263_s20 = scalar_lea.hbm %s2803_s0, 128 }
  0x32   : > { %p2259_p0 = scmp.ne.s32.totalorder %s2518_s11, %s2258_s10  ;;  %p2260_p3 = pneg %p2520_p11 }
  0x33   : > { %p2264_p10 = scmp.lt.u32.totalorder %s2518_s11, %s2803_s0  ;;  %p2265_p1 = scmp.lt.u32.totalorder %s2263_s20, %s2258_s10 }
  0x34   : > { %p2261_p5 = pnand %p2260_p3, %p2259_p0  ;;  %p2267_p4 = scmp.lt.u32.totalorder %s2258_s10, %s2518_s11 }
  0x35   : > { %p2266_p2 = por %p2265_p1, %p2264_p10 }
  0x36   : > { %p2262_p7 = pneg %p2261_p5 }
  0x37   : > { %p2268_p6 = por %p2267_p4, %p2266_p2 }
  0x39   : > { %p2269_p9 = pnand %p2268_p6, %p2262_p7 }
  0x3b   : > { %2272 = shalt.err (!%p2269_p9)
}
  0x3c   : > { %s2273_s18 = scalar_lea.vmem %s2524_s16, 64  ;;  %s2361_s15 = smov [#allocation2]  }
  0x3d   : > { %p2274_p12 = scmp.ne.s32.totalorder %s2524_s16, %s2273_s18  ;;  %s2278_s14 = sshll.u32 %s2361_s15, 4  ;;  %s2279_s14 = int_to_ptr.vmem [resolvable:$false] %s2278_s14 }
  0x3e   : > { %s2280_s19 = scalar_lea.vmem %s2279_s14, 128  ;;  %p2281_p5 = scmp.lt.s32.totalorder %s2524_s16, %s2279_s14 }
  0x3f   : > { %p2276_p13 = pnand %p2274_p12, %p2260_p3  ;;  %p2282_p10 = scmp.lt.s32.totalorder %s2280_s19, %s2273_s18 }
  0x41   : > { %p2277_p0 = pneg %p2276_p13  ;;  %p2283_p1 = por %p2282_p10, %p2281_p5 }
  0x43   : > { %p2284_p2 = pnand %p2283_p1, %p2277_p0 }
  0x45   : > { %2287 = shalt.err (!%p2284_p2)
}
  0x46   : > { %2112 = dma.hbm_to_vmem [thread:$0]  (!%p2520_p11), %s2518_s11, 64, %s2524_s16, %s247_s29  }
  0x47   : > { %p2825_p7 = scmp.ne.s32.totalorder %s2816_s9, 0 }
  0x48   : > { %s2554_s10 = sand.u32 (!%p2825_p7), 1, %s2350_s25   ;;  %p2826_p3 = scmp.ne.s32.totalorder (!%p2825_p7), %s2814_s30, 0 }
  0x49   : > { %266 = sbr.rel (%p2825_p7) target bundleno = 3351 (0xd17), region = 48  ;;  %s1821_s20 = sshll.u32 (!%p2825_p7), %s2554_s10, 2 }
  0x4a   : > { %s269_s21 = scalar_lea.sflag (!%p2825_p7), [#allocation3], %s2554_s10  ;;  %s272_s22 = scalar_lea.vmem (!%p2825_p7), [#allocation2], %s1821_s20 }
  0x50   : > { %2333 = dma.done.wait (%p2826_p3), %s269_s21, 64  }
  0x51   : > { %2335 = vsyncadd (%p2826_p3), %s269_s21, 4294967232  ;;  %p2827_p11 = scmp.eq.s32.totalorder %s2434_s28, 0 }
  0x53   : > { %2337 = dma.done.wait (%p2827_p11), [#allocation6], 64   ;;  %p2828_p4 = pmov %p2827_p11 }
  0x54   : > { %vm308_vm0 = vcmask 125952   ;;  %v2568_v0 = vld [vmem:[%s272_s22] sm:$0xf]  ;;  %vm341_vm1 = vcmask 31744   ;;  %v460_v9 = vld [vmem:[%s2805_s2 + $0x8] sm:$0xff]  ;;  %vm360_vm2 = vcmask 1043456  }
  0x55   : > { %2339 = vsyncadd (%p2828_p4), [#allocation6], 4294967232  ;;  %v309_v1 = vsel %vm308_vm0, %v2568_v0, 0.0  ;;  %v335_v7 = vld [vmem:[%s2804_s1] sm:$0xff]  ;;  %v336_v20 = vld [vmem:[%s2804_s1 + $0x8] sm:$0xff]  ;;  %vm466_vm3 = vcmask 130048  }
  0x56   : > { %310 = vadd.xlane.f32.xlu0 %v309_v1  ;;  %1938 = vmatprep.mubr.msk.f32.mxu0 %vm341_vm1, %v335_v7  ;;  %v459_v8 = vld [vmem:[%s2805_s2] sm:$0xff]  ;;  %v337_v21 = vld [vmem:[%s2804_s1 + $0x10] sm:$0xff]  ;;  %v338_v22 = vld [vmem:[%s2804_s1 + $0x18] sm:$0xff]  ;;  %s2362_s23 = smov 124   ;;  %s2363_s22 = smov 120   ;;  %vm1544_vm5 = vcmask 64512  }
  0x57   : > { %v2038_v10 = vpack.c.bf16 %v460_v9, %v459_v8  ;;  %v1824_v15 = vld [vmem:[%s2807_s4] ss:$0 sm:$0xff]  ;;  %v1825_v17 = vld [vmem:[%s2807_s4 + $0x1] ss:$0 sm:$0xff]  ;;  %v1836_v23 = vld [vmem:[%s2805_s2 + $0x10] sm:$0xff]  ;;  %s2364_s30 = smov 116  }
  0x58   : > { %v1837_v24 = vld [vmem:[%s2805_s2 + $0x18] sm:$0xff]  ;;  %v339_v26 = vld [vmem:[%s2804_s1 + $0x20] sm:$0xff]  ;;  %v340_v27 = vld [vmem:[%s2804_s1 + $0x28] sm:$0xff]  ;;  %s2365_s9 = smov 4   ;;  %s2366_s11 = smov 8   ;;  %vm1547_vm6 = vcmask 97280  }
  0x59   : > { %2039 = vmatprep.subr.bf16.mxu1 %v2038_v10  ;;  %v2042_v25 = vpack.c.bf16 %v1837_v24, %v1836_v23  ;;  %v1833_v32 = vld [vmem:[%s2807_s4 + $0x2] ss:$0 sm:$0xff]  ;;  %v1838_v37 = vld [vmem:[%s2807_s4 + $0x3] ss:$0 sm:$0xff]  ;;  %vm2636_vm4 = vmpackc.low %vm341_vm1, %vm341_vm1  ;;  %s2367_s15 = smov 12   ;;  %vm2369_vm7 = vmmov 0  }
  0x5a   : > { %2041 = vmatpush3.bf16.msra.mxu1 %v2038_v10  ;;  %v1841_v45 = vld [vmem:[%s2805_s2 + $0x20] sm:$0xff]  ;;  %v1842_v46 = vld [vmem:[%s2805_s2 + $0x28] sm:$0xff] }
  0x5b   : > { %2043 = vmatprep.subr.bf16.mxu1 %v2042_v25  ;;  %v2046_v48 = vpack.c.bf16 %v1842_v46, %v1841_v45  ;;  %v1843_v56 = vld [vmem:[%s2807_s4 + $0x4] ss:$0 sm:$0xff] }
  0xe3   : > { %v311_v2 = vpop.xlane.xlu0 %310 }
  0xe4   : > { %v313_v3 = vmul.f32 0.0625, %v311_v2 }
  0xe6   : > { %v314_v4 = vsub.f32 %v2568_v0, %v313_v3 }
  0xe8   : > { %v315_v5 = vmul.f32 %v314_v4, %v314_v4 }
  0xea   : > { %v316_v6 = vsel %vm308_vm0, %v315_v5, 0.0 }
  0xeb   : > { %317 = vadd.xlane.f32.xlu0 %v316_v6 }
 0x178   : > { %v318_v11 = vpop.xlane.xlu0 %317 }
 0x179   : > { %v319_v12 = vmul.f32 0.0625, %v318_v11 }
 0x17b   : > { %v320_v13 = vadd.f32 1e-05, %v319_v12 }
 0x17d   : > { %2196 = vrsqrt.f32 %v320_v13 }
 0x187   : > { %v2197_v14 = vpop.eup %2196 }
 0x188   : > { %v322_v16 = vmul.f32 %v2197_v14, %v314_v4 }
 0x18a   : > { %v328_v18 = vmul.f32 %v1824_v15, %v322_v16 }
 0x18c   : > { %v334_v19 = vadd.f32 %v1825_v17, %v328_v18 }
 0x18e   : > { %1936 = vmatprep.subr.msk.mxu0 %vm360_vm2, %v334_v19 }
 0x18f   : > { %1937 = vmatpush3.msk.msra.mxu0 %vm360_vm2, %v334_v19 }
 0x190   : > { %1939 = vmatmul.mubr.msk.f32.vlgmr.msra.gmra.mrb[0].mxu0 %vm341_vm1, %v336_v20 }
 0x191   : > { %1941 = vmatprep.mubr.msk.f32.mxu0 %vm341_vm1, %v337_v21 }
 0x194   : > { %1942 = vmatmul.mubr.msk.f32.gmra.mrb[2].mxu0 %vm341_vm1, %v338_v22 }
 0x195   : > { %1944 = vmatprep.mubr.msk.f32.mxu0 %vm341_vm1, %v339_v26 }
 0x198   : > { %1945 = vmatmul.mubr.msk.f32.gmra.mrb[4].mxu0 %vm341_vm1, %v340_v27 }
 0x263   : > { %v1940_v28 = vpop.f32.mrb[0].mxu0 }
 0x264   : > { %v430_v29 = vpop.f32.mrb[1].mxu0 }
 0x265   : > { %1951 = vmatprep.mubr.msk.f32.mxu1 %vm466_vm3, %v430_v29 }
 0x266   : > { %1952 = vmatmul.mubr.msk.f32.vlgmr.msra.gmra.mrb[0].mxu1 %vm466_vm3, %v1940_v28 }
 0x267   : > { %v1943_v30 = vpop.f32.mrb[2].mxu0  ;;  %2045 = vmatpush3.bf16.msra.mxu1 %v2042_v25 }
 0x268   : > { %v440_v31 = vpop.f32.mrb[3].mxu0  ;;  %2047 = vmatprep.subr.bf16.mxu1 %v2046_v48 }
 0x269   : > { %1958 = vmatprep.mubr.msk.f32.mxu1 %vm466_vm3, %v440_v31 }
 0x26a   : > { %1959 = vmatmul.mubr.msk.f32.vlgmr.msra.gmra.mrb[2].mxu1 %vm466_vm3, %v1943_v30 }
 0x26b   : > { %v1946_v47 = vpop.f32.mrb[4].mxu0  ;;  %2049 = vmatpush3.bf16.msra.mxu1 %v2046_v48 }
 0x26c   : > { %v450_v49 = vpop.f32.mrb[5].mxu0 }
 0x26d   : > { %1965 = vmatprep.mubr.msk.f32.mxu1 %vm466_vm3, %v450_v49 }
 0x26e   : > { %1966 = vmatmul.mubr.msk.f32.vlgmr.msra.gmra.mrb[4].mxu1 %vm466_vm3, %v1946_v47 }
 0x339   : > { %v1953_v33 = vpop.f32.mrb[0].mxu1 }
 0x33a   : > { %v2623_v34 = vadd.f32 %v1953_v33, %v1833_v32  ;;  %v539_v35 = vpop.f32.mrb[1].mxu1 }
 0x33b   : > { %v2625_v36 = vadd.f32 %v1833_v32, %v539_v35 }
 0x33c   : > { %918 = vrot.lane.b32.xlu0 %v2623_v34, %s2362_s23 }
 0x33d   : > { %v1960_v38 = vpop.f32.mrb[2].mxu1  ;;  %1972 = vmatprep.mubr.msk.f32.mxu0 %vm341_vm1, %v2625_v36 }
 0x33e   : > { %v634_v39 = vadd.f32 %v1960_v38, %v1838_v37  ;;  %v628_v40 = vpop.f32.mrb[3].mxu1 }
 0x33f   : > { %v629_v41 = vadd.f32 %v1838_v37, %v628_v40 }
 0x341   : > { %v2640_v43 = vpack.i.bf16 %v634_v39, %v629_v41  ;;  %v2050_v44 = vpack.c.bf16 %v634_v39, %v629_v41  ;;  %v1967_v57 = vpop.f32.mrb[4].mxu1 }
 0x342   : > { %v723_v58 = vadd.f32 %v1967_v57, %v1843_v56  ;;  %v717_v59 = vpop.f32.mrb[5].mxu1 }
 0x343   : > { %2165 = vrot.lane.b32.xlu1 %v2640_v43, %s2362_s23  ;;  %2052 = vmatprep.subr.msk.bf16.mxu0 %vm2636_vm4, %v2050_v44  ;;  %v718_v61 = vadd.f32 %v1843_v56, %v717_v59 }
 0x344   : > { %2055 = vmatpush3.bf16.xpose.msk.msra.mxu0 %vm2636_vm4, %v2050_v44 }
 0x345   : > { %v2671_v2 = vpack.i.bf16 %v723_v58, %v718_v61  ;;  %v2056_v3 = vpack.c.bf16 %v723_v58, %v718_v61 }
 0x347   : > { %916 = vrot.lane.b32.xlu1 %v2625_v36, %s2362_s23  ;;  %2057 = vmatprep.subr.bf16.mxu1 %v2056_v3 }
 0x348   : > { %2059 = vmatpush3.bf16.msra.mxu1 %v2056_v3 }
 0x34b   : > { %1973 = vmatmul.mubr.msk.f32.vlgmr.msra.gmra.mrb[6].mxu0 %vm341_vm1, %v2623_v34 }
 0x3ae   : > { %v919_v55 = vpop.permute.xlu0 %918 }
 0x3b5   : > { %v2166_v50 = vpop.permute.xlu1 %2165 }
 0x3b6   : > { %v2168_v51 = vunpack.i.h.bf16 %v2166_v50  ;;  %v2167_v52 = vunpack.i.l.bf16 %v2166_v50 }
 0x3b8   : > { %v2060_v53 = vpack.c.bf16 %v2168_v51, %v2167_v52 }
 0x3b9   : > { %v917_v54 = vpop.permute.xlu1 %916 }
 0x3ba   : > { %2062 = vmatprep.subr.msk.bf16.mxu0 %vm2636_vm4, %v2060_v53  ;;  %1986 = vmatprep.mubr.msk.f32.mxu0 %vm341_vm1, %v917_v54 }
 0x3bb   : > { %2065 = vmatpush3.bf16.xpose.msk.msra.mxu0 %vm2636_vm4, %v2060_v53 }
 0x3c2   : > { %1987 = vmatmul.mubr.msk.f32.vlgmr.msra.gmra.mrb[8].mxu0 %vm341_vm1, %v919_v55 }
 0x41e   : > { %v1974_v60 = vpop.f32.mrb[6].mxu0 }
 0x41f   : > { %v804_v62 = vpop.f32.mrb[7].mxu0  ;;  %v816_v63 = vsel %vm466_vm3, %v1974_v60, -inf }
 0x420   : > { %817 = vmax.xlane.f32.xlu0 %v816_v63  ;;  %v813_v1 = vsel %vm466_vm3, %v804_v62, -inf }
 0x421   : > { %814 = vmax.xlane.f32.xlu1 %v813_v1 }
 0x495   : > { %v1988_v4 = vpop.f32.mrb[8].mxu0 }
 0x496   : > { %v998_v5 = vpop.f32.mrb[9].mxu0  ;;  %v1010_v6 = vsel %vm466_vm3, %v1988_v4, -inf }
 0x497   : > { %1011 = vmax.xlane.f32.xlu1 %v1010_v6  ;;  %v1007_v7 = vsel %vm466_vm3, %v998_v5, -inf }
 0x49b   : > { %1008 = vmax.xlane.f32.xlu1 %v1007_v7 }
 0x4ac   : > { %2170 = vrot.lane.b32.xlu1 %v2671_v2, %s2362_s23 }
 0x4ad   : > { %v818_v8 = vpop.xlane.xlu0 %817 }
 0x4ae   : > { %v820_v9 = vsub.f32 %v1974_v60, %v818_v8  ;;  %v815_v10 = vpop.xlane.xlu1 %814 }
 0x4af   : > { %v819_v12 = vsub.f32 %v804_v62, %v815_v10 }
 0x4b0   : > { %v823_v11 = vmul.f32 1.442695, %v820_v9 }
 0x4b1   : > { %v821_v13 = vmul.f32 1.442695, %v819_v12 }
 0x4b2   : > { %2198 = vpow2.f32 %v823_v11 }
 0x4b3   : > { %2200 = vpow2.f32 %v821_v13 }
 0x4bc   : > { %v2199_v14 = vpop.eup %2198 }
 0x4bd   : > { %v828_v15 = vsel %vm466_vm3, %v2199_v14, 0.0  ;;  %v2201_v16 = vpop.eup %2200 }
 0x4be   : > { %v825_v17 = vsel %vm466_vm3, %v2201_v16, 0.0 }
 0x4d0   : > { %829 = vadd.xlane.f32.xlu1 %v828_v15 }
 0x4d4   : > { %826 = vadd.xlane.f32.xlu1 %v825_v17 }
 0x4e5   : > { %1118 = vrot.lane.b32.xlu1 %v2625_v36, %s2363_s22 }
 0x524   : > { %v1012_v18 = vpop.xlane.xlu1 %1011 }
 0x525   : > { %v1014_v19 = vsub.f32 %v1988_v4, %v1012_v18 }
 0x527   : > { %v1017_v20 = vmul.f32 1.442695, %v1014_v19 }
 0x528   : > { %v1009_v21 = vpop.xlane.xlu1 %1008 }
 0x529   : > { %2202 = vpow2.f32 %v1017_v20  ;;  %v1013_v22 = vsub.f32 %v998_v5, %v1009_v21 }
 0x52b   : > { %v1015_v23 = vmul.f32 1.442695, %v1013_v22 }
 0x52c   : > { %v2171_v24 = vpop.permute.xlu1 %2170 }
 0x52d   : > { %2204 = vpow2.f32 %v1015_v23  ;;  %v2173_v25 = vunpack.i.h.bf16 %v2171_v24  ;;  %v2172_v26 = vunpack.i.l.bf16 %v2171_v24 }
 0x52f   : > { %v2066_v27 = vpack.c.bf16 %v2173_v25, %v2172_v26 }
 0x531   : > { %2067 = vmatprep.subr.bf16.mxu1 %v2066_v27 }
 0x533   : > { %v2203_v28 = vpop.eup %2202 }
 0x534   : > { %v1022_v29 = vsel %vm466_vm3, %v2203_v28, 0.0 }
 0x535   : > { %1023 = vadd.xlane.f32.xlu0 %v1022_v29 }
 0x537   : > { %v2205_v30 = vpop.eup %2204 }
 0x538   : > { %v1019_v31 = vsel %vm466_vm3, %v2205_v30, 0.0 }
 0x539   : > { %1020 = vadd.xlane.f32.xlu1 %v1019_v31 }
 0x54a   : > { %1120 = vrot.lane.b32.xlu1 %v2623_v34, %s2363_s22 }
 0x54b   : > { %2175 = vrot.lane.b32.xlu0 %v2640_v43, %s2363_s22 }
 0x55d   : > { %v830_v32 = vpop.xlane.xlu1 %829 }
 0x55e   : > { %2206 = vrcp.f32 %v830_v32 }
 0x561   : > { %v827_v33 = vpop.xlane.xlu1 %826 }
 0x562   : > { %2208 = vrcp.f32 %v827_v33 }
 0x565   : > { %v1119_v40 = vpop.permute.xlu1 %1118 }
 0x568   : > { %v2207_v35 = vpop.eup %2206 }
 0x569   : > { %v834_v39 = vmul.f32 %v2207_v35, %v2199_v14 }
 0x56c   : > { %v2209_v37 = vpop.eup %2208 }
 0x56d   : > { %v833_v38 = vmul.f32 %v2209_v37, %v2201_v16 }
 0x56f   : > { %1979 = vmatprep.mubr.msk.f32.mxu1 %vm466_vm3, %v833_v38 }
 0x570   : > { %1980 = vmatmul.mubr.msk.f32.vlgmr.msra.gmra.mrb[6].mxu1 %vm466_vm3, %v834_v39 }
 0x571   : > { %2069 = vmatpush3.bf16.msra.mxu1 %v2066_v27 }
 0x5c2   : > { %v1024_v41 = vpop.xlane.xlu0 %1023 }
 0x5c3   : > { %2210 = vrcp.f32 %v1024_v41 }
 0x5c6   : > { %v2176_v44 = vpop.permute.xlu0 %2175  ;;  %v1021_v45 = vpop.xlane.xlu1 %1020 }
 0x5c7   : > { %v2178_v46 = vunpack.i.h.bf16 %v2176_v44  ;;  %v2177_v47 = vunpack.i.l.bf16 %v2176_v44  ;;  %2212 = vrcp.f32 %v1021_v45 }
 0x5c9   : > { %v2070_v48 = vpack.c.bf16 %v2178_v46, %v2177_v47 }
 0x5ca   : > { %v1121_v53 = vpop.permute.xlu1 %1120 }
 0x5cb   : > { %2072 = vmatprep.subr.msk.bf16.mxu1 %vm2636_vm4, %v2070_v48 }
 0x5cd   : > { %v2211_v49 = vpop.eup %2210 }
 0x5ce   : > { %v1028_v52 = vmul.f32 %v2211_v49, %v2203_v28 }
 0x5d1   : > { %v2213_v50 = vpop.eup %2212 }
 0x5d2   : > { %v1027_v51 = vmul.f32 %v2213_v50, %v2205_v30 }
 0x5d4   : > { %1993 = vmatprep.mubr.msk.f32.mxu1 %vm466_vm3, %v1027_v51  ;;  %v1550_v51 = vld [vmem:[%s2806_s3] sm:$0xff] }
 0x5d5   : > { %1994 = vmatmul.mubr.msk.f32.vlgmr.msra.gmra.mrb[8].mxu1 %vm466_vm3, %v1028_v52  ;;  %v1551_v52 = vld [vmem:[%s2806_s3 + $0x8] sm:$0xff] }
 0x5d6   : > { %2075 = vmatpush3.bf16.xpose.msk.msra.mxu1 %vm2636_vm4, %v2070_v48  ;;  %2000 = vmatprep.mubr.msk.f32.mxu1 %vm341_vm1, %v1119_v40 }
 0x5dd   : > { %2001 = vmatmul.mubr.msk.f32.vlgmr.msra.gmra.mrb[10].mxu1 %vm341_vm1, %v1121_v53  ;;  %v2090_v53 = vpack.c.bf16 %v1551_v52, %v1550_v51 }
 0x643   : > { %v2697_v54 = vpop.f32.mrb[6].mxu1 }
 0x644   : > { %v2699_v55 = vpop.f32.mrb[7].mxu1 }
 0x6a8   : > { %v1995_v56 = vpop.f32.mrb[8].mxu1 }
 0x6a9   : > { %v2701_v57 = vpop.f32.mrb[9].mxu1 }
 0x6b0   : > { %v2002_v58 = vpop.f32.mrb[10].mxu1 }
 0x6b1   : > { %v1200_v59 = vpop.f32.mrb[11].mxu1  ;;  %v1212_v60 = vsel %vm466_vm3, %v2002_v58, -inf }
 0x6b2   : > { %1213 = vmax.xlane.f32.xlu1 %v1212_v60  ;;  %v1209_v61 = vsel %vm466_vm3, %v1200_v59, -inf }
 0x6b3   : > { %1210 = vmax.xlane.f32.xlu0 %v1209_v61 }
 0x6c3   : > { %2180 = vrot.lane.b32.xlu1 %v2671_v2, %s2363_s22 }
 0x6c7   : > { %1318 = vrot.lane.b32.xlu1 %v2625_v36, %s2364_s30 }
 0x6cb   : > { %1320 = vrot.lane.b32.xlu1 %v2623_v34, %s2364_s30 }
 0x73f   : > { %v1214_v62 = vpop.xlane.xlu1 %1213 }
 0x740   : > { %v1216_v63 = vsub.f32 %v2002_v58, %v1214_v62  ;;  %v1211_v1 = vpop.xlane.xlu0 %1210 }
 0x741   : > { %v1215_v3 = vsub.f32 %v1200_v59, %v1211_v1 }
 0x742   : > { %v1219_v4 = vmul.f32 1.442695, %v1216_v63 }
 0x743   : > { %v1217_v5 = vmul.f32 1.442695, %v1215_v3  ;;  %v2181_v6 = vpop.permute.xlu1 %2180 }
 0x744   : > { %2214 = vpow2.f32 %v1219_v4  ;;  %v2183_v7 = vunpack.i.h.bf16 %v2181_v6  ;;  %v2182_v8 = vunpack.i.l.bf16 %v2181_v6 }
 0x745   : > { %2216 = vpow2.f32 %v1217_v5 }
 0x746   : > { %v2076_v9 = vpack.c.bf16 %v2183_v7, %v2182_v8  ;;  %v2368_v8 = vmov 0.0|0.0  }
 0x747   : > { %v1319_v22 = vpop.permute.xlu1 %1318 }
 0x748   : > { %2077 = vmatprep.subr.bf16.mxu0 %v2076_v9 }
 0x749   : > { %2079 = vmatpush3.bf16.msra.mxu0 %v2076_v9  ;;  %v2370_v9 = vmov 0.0  }
 0x74e   : > { %v2215_v10 = vpop.eup %2214 }
 0x74f   : > { %v1224_v36 = vsel %vm466_vm3, %v2215_v10, 0.0  ;;  %v2217_v11 = vpop.eup %2216 }
 0x750   : > { %1225 = vadd.xlane.f32.xlu0 %v1224_v36  ;;  %v1221_v34 = vsel %vm466_vm3, %v2217_v11, 0.0 }
 0x754   : > { %1222 = vadd.xlane.f32.xlu0 %v1221_v34 }
 0x76a   : > { %2185 = vrot.lane.b32.xlu0 %v2640_v43, %s2364_s30  ;;  %v1321_v43 = vpop.permute.xlu1 %1320 }
 0x7dd   : > { %v1226_v12 = vpop.xlane.xlu0 %1225 }
 0x7de   : > { %2218 = vrcp.f32 %v1226_v12 }
 0x7e1   : > { %v1223_v13 = vpop.xlane.xlu0 %1222 }
 0x7e2   : > { %2220 = vrcp.f32 %v1223_v13 }
 0x7e5   : > { %v2186_v14 = vpop.permute.xlu0 %2185 }
 0x7e6   : > { %v2188_v15 = vunpack.i.h.bf16 %v2186_v14  ;;  %v2187_v16 = vunpack.i.l.bf16 %v2186_v14  ;;  %v1638_v14 = vld [vmem:[#allocation5] sm:$0xf] }
 0x7e8   : > { %v2080_v17 = vpack.c.bf16 %v2188_v15, %v2187_v16  ;;  %v2219_v18 = vpop.eup %2218 }
 0x7e9   : > { %v1230_v21 = vmul.f32 %v2219_v18, %v2215_v10  ;;  %v1870_v10 = vld [vmem:[%s2807_s4 + $0x5] ss:$0 sm:$0xff] }
 0x7ea   : > { %2082 = vmatprep.subr.msk.bf16.mxu0 %vm2636_vm4, %v2080_v17 }
 0x7ec   : > { %v2221_v19 = vpop.eup %2220 }
 0x7ed   : > { %v1229_v20 = vmul.f32 %v2221_v19, %v2217_v11 }
 0x7ef   : > { %2007 = vmatprep.mubr.msk.f32.mxu0 %vm466_vm3, %v1229_v20 }
 0x7f0   : > { %2008 = vmatmul.mubr.msk.f32.vlgmr.msra.gmra.mrb[10].mxu0 %vm466_vm3, %v1230_v21 }
 0x7f1   : > { %2085 = vmatpush3.bf16.xpose.msk.msra.mxu0 %vm2636_vm4, %v2080_v17  ;;  %2014 = vmatprep.mubr.msk.f32.mxu0 %vm341_vm1, %v1319_v22 }
 0x7f2   : > { %2094 = vmatprep.subr.bf16.mxu0 %v2368_v8 }
 0x7f8   : > { %2015 = vmatmul.mubr.msk.f32.vlgmr.msra.gmra.mrb[12].mxu0 %vm341_vm1, %v1321_v43 }
 0x7f9   : > { %2035 = vmatprep.mubr.msk.f32.mxu0 %vm2369_vm7, %v2370_v9 }
 0x8c3   : > { %v2009_v23 = vpop.f32.mrb[10].mxu0 }
 0x8c4   : > { %v1309_v24 = vpop.f32.mrb[11].mxu0 }
 0x8cb   : > { %v2016_v25 = vpop.f32.mrb[12].mxu0 }
 0x8cc   : > { %v1400_v26 = vpop.f32.mrb[13].mxu0  ;;  %v1412_v27 = vsel %vm466_vm3, %v2016_v25, -inf }
 0x8cd   : > { %1413 = vmax.xlane.f32.xlu1 %v1412_v27  ;;  %v1409_v28 = vsel %vm466_vm3, %v1400_v26, -inf }
 0x8ce   : > { %1410 = vmax.xlane.f32.xlu0 %v1409_v28 }
 0x8de   : > { %2190 = vrot.lane.b32.xlu1 %v2671_v2, %s2364_s30  ;;  %s1875_s30 = sshll.u32 %s2434_s28, 6  ;;  %s1721_s28 = scalar_lea.sflag [#allocation4], %s2554_s10 }
 0x8df   : > { %s2758_s29 = scalar_lea.hbm %s2810_s7, %s1875_s30 }
 0x8e2   : > { %1522 = vrot.lane.b32.xlu1 %v1995_v56, %s2365_s9 }
 0x8e6   : > { %1528 = vrot.lane.b32.xlu1 %v1309_v24, %s2366_s11 }
 0x95a   : > { %v1414_v42 = vpop.xlane.xlu1 %1413 }
 0x95b   : > { %v1416_v29 = vsub.f32 %v2016_v25, %v1414_v42  ;;  %v1411_v30 = vpop.xlane.xlu0 %1410 }
 0x95c   : > { %v1415_v31 = vsub.f32 %v1400_v26, %v1411_v30 }
 0x95d   : > { %v1419_v32 = vmul.f32 1.442695, %v1416_v29 }
 0x95e   : > { %v1417_v33 = vmul.f32 1.442695, %v1415_v31  ;;  %v2191_v35 = vpop.permute.xlu1 %2190 }
 0x95f   : > { %v2193_v37 = vunpack.i.h.bf16 %v2191_v35  ;;  %v2192_v38 = vunpack.i.l.bf16 %v2191_v35 }
 0x960   : > { %2222 = vpow2.f32 %v1417_v33 }
 0x961   : > { %v2086_v39 = vpack.c.bf16 %v2193_v37, %v2192_v38  ;;  %2224 = vpow2.f32 %v1419_v32 }
 0x962   : > { %v1523_v59 = vpop.permute.xlu1 %1522 }
 0x963   : > { %2087 = vmatprep.subr.bf16.mxu1 %v2086_v39  ;;  %v1543_v1 = vsel %vm341_vm1, %v2697_v54, %v1523_v59  ;;  %v2371_v54 = vmov 0  }
 0x964   : > { %2089 = vmatpush3.bf16.msra.mxu1 %v2086_v39  ;;  %2194 = vset.pattern.permute.xlu1 %v2371_v54 }
 0x965   : > { %2091 = vmatprep.subr.bf16.mxu1 %v2090_v53  ;;  %2195 = vset.pattern.permute.xlu0 %v2371_v54 }
 0x966   : > { %v1529_v61 = vpop.permute.xlu1 %1528 }
 0x96a   : > { %v2223_v40 = vpop.eup %2222 }
 0x96b   : > { %v1421_v2 = vsel %vm466_vm3, %v2223_v40, 0.0  ;;  %v2225_v41 = vpop.eup %2224 }
 0x96c   : > { %1422 = vadd.xlane.f32.xlu0 %v1421_v2  ;;  %v1424_v44 = vsel %vm466_vm3, %v2225_v41, 0.0 }
 0x970   : > { %1425 = vadd.xlane.f32.xlu0 %v1424_v44 }
 0x986   : > { %1520 = vrot.lane.b32.xlu0 %v2701_v57, %s2365_s9  ;;  %s306_s9 = scalar_lea.vmem [#allocation7], %s1821_s20  ;;  %s2372_s20 = smov [#allocation7]  }
 0x98a   : > { %1530 = vrot.lane.b32.xlu0 %v2009_v23, %s2366_s11  ;;  %s1734_s11 = sshll.u32 %s306_s9, 4  ;;  %s2760_s11 = int_to_ptr.vmem [resolvable:$true] %s1734_s11 }
 0x98b   : > { %s2288_s18 = scalar_lea.vmem %s2760_s11, 64 }
 0x98c   : > { %p2289_p6 = scmp.ne.s32.totalorder %s2760_s11, %s2288_s18 }
 0x98e   : > { %p2290_p9 = pnand %p2289_p6, %p2505_p8 }
 0x990   : > { %p2291_p12 = pneg %p2290_p9 }
 0x9f9   : > { %v1423_v45 = vpop.xlane.xlu0 %1422 }
 0x9fa   : > { %2226 = vrcp.f32 %v1423_v45 }
 0x9fd   : > { %v1426_v46 = vpop.xlane.xlu0 %1425 }
 0x9fe   : > { %2228 = vrcp.f32 %v1426_v46 }
 0xa01   : > { %v1521_v58 = vpop.permute.xlu0 %1520 }
 0xa02   : > { %v1542_v62 = vsel %vm341_vm1, %v2699_v55, %v1521_v58  ;;  %v1639_v55 = vld [vmem:[%s2809_s6] sm:$0xf] }
 0xa03   : > { %v1545_v4 = vsel %vm1544_vm5, %v1542_v62, %v1529_v61 }
 0xa04   : > { %v2227_v47 = vpop.eup %2226 }
 0xa05   : > { %v1429_v48 = vmul.f32 %v2227_v47, %v2223_v40  ;;  %v1531_v60 = vpop.permute.xlu0 %1530 }
 0xa06   : > { %v1546_v5 = vsel %vm1544_vm5, %v1543_v1, %v1531_v60 }
 0xa07   : > { %2021 = vmatprep.mubr.msk.f32.mxu1 %vm466_vm3, %v1429_v48 }
 0xa08   : > { %v2229_v49 = vpop.eup %2228 }
 0xa09   : > { %v1430_v50 = vmul.f32 %v2229_v49, %v2225_v41 }
 0xa0b   : > { %2022 = vmatmul.mubr.msk.f32.vlgmr.msra.gmra.mrb[12].mxu1 %vm466_vm3, %v1430_v50 }
 0xa0c   : > { %2093 = vmatpush3.bf16.msra.mxu1 %v2090_v53 }
 0xade   : > { %v2023_v56 = vpop.f32.mrb[12].mxu1 }
 0xadf   : > { %1538 = vrot.lane.b32.xlu0 %v2023_v56, %s2367_s15  ;;  %v1509_v57 = vpop.f32.mrb[13].mxu1 }
 0xae0   : > { %1536 = vrot.lane.b32.xlu1 %v1509_v57, %s2367_s15  ;;  %s2292_s15 = sshll.u32 %s2372_s20, 4  ;;  %s2293_s15 = int_to_ptr.vmem [resolvable:$false] %s2292_s15 }
 0xae1   : > { %s2294_s14 = scalar_lea.vmem %s2293_s15, 128  ;;  %p2295_p13 = scmp.lt.s32.totalorder %s2760_s11, %s2293_s15 }
 0xae2   : > { %p2296_p0 = scmp.lt.s32.totalorder %s2294_s14, %s2288_s18 }
 0xae4   : > { %1642 = vperm.xlu1 %2194, %v1639_v55   ;;  %p2297_p5 = por %p2296_p0, %p2295_p13 }
 0xae6   : > { %p2298_p10 = pnand %p2297_p5, %p2291_p12 }
 0xb51   : > { %v1539_v63 = vpop.permute.xlu0 %1538 }
 0xb52   : > { %v1537_v3 = vpop.permute.xlu1 %1536  ;;  %v1549_v7 = vsel %vm1547_vm6, %v1546_v5, %v1539_v63 }
 0xb53   : > { %v1548_v6 = vsel %vm1547_vm6, %v1545_v4, %v1537_v3 }
 0xb54   : > { %2028 = vmatprep.mubr.msk.f32.mxu1 %vm466_vm3, %v1548_v6 }
 0xb55   : > { %2029 = vmatmul.mubr.msk.f32.vlgmr.msra.gmra.mrb[14].mxu1 %vm466_vm3, %v1549_v7 }
 0xb63   : > { %v1643_v15 = vpop.permute.xlu1 %1642 }
 0xc28   : > { %v2030_v36 = vpop.f32.mrb[14].mxu1 }
 0xc29   : > { %v1635_v11 = vadd.f32 %v2030_v36, %v1870_v10  ;;  %v1629_v34 = vpop.f32.mrb[15].mxu1 }
 0xc2a   : > { %v1630_v12 = vadd.f32 %v1870_v10, %v1629_v34 }
 0xc2c   : > { %v2095_v13 = vpack.c.bf16 %v1635_v11, %v1630_v12 }
 0xc2e   : > { %2096 = vmatpush3.bf16.msra.mxu0 %v2095_v13 }
 0xc31   : > { %2036 = vmatmul.mubr.msk.f32.vlgmr.msra.gmra.mrb[14].mxu0 %vm466_vm3, %v1638_v14 }
 0xd04   : > { %v1714_v16 = vpop.f32.mrb[14].mxu0 }
 0xd05   : > { %v1715_v17 = vadd.f32 %v1714_v16, %v1643_v15  ;;  %v2037_v18 = vpop.f32.mrb[15].mxu0 }
 0xd07   : > { %v1718_v19 = vadd.f32 %v1715_v17, %v2568_v0 }
 0xd09   : > { %1719 = vst.msk [vmem:[%s306_s9] sm:$0xf] %vm308_vm0, %v1718_v19 }
 0xd0a   : > { %2301 = shalt.err (!%p2298_p10)
}
 0xd0b   : > { %s2302_s10 = scalar_lea.hbm %s2758_s29, 64  ;;  %s2306_s22 = scalar_lea.hbm %s2810_s7, 128 }
 0xd0c   : > { %p2303_p1 = scmp.ne.s32.totalorder %s2758_s29, %s2302_s10  ;;  %p2307_p3 = scmp.lt.u32.totalorder %s2758_s29, %s2810_s7 }
 0xd0d   : > { %p2308_p11 = scmp.lt.u32.totalorder %s2306_s22, %s2302_s10  ;;  %p2310_p6 = scmp.lt.u32.totalorder %s2302_s10, %s2758_s29 }
 0xd0e   : > { %p2304_p2 = pnand %p2303_p1, %p2505_p8 }
 0xd0f   : > { %p2309_p4 = por %p2308_p11, %p2307_p3 }
 0xd10   : > { %p2305_p7 = pneg %p2304_p2 }
 0xd11   : > { %p2311_p9 = por %p2310_p6, %p2309_p4 }
 0xd13   : > { %p2312_p12 = pnand %p2311_p9, %p2305_p7 }
 0xd15   : > { %2315 = shalt.err (!%p2312_p12)
}
 0xd16   : > { %2103 = dma.vmem_to_hbm [thread:$0]  (%p2505_p8), %s2760_s11, 64, %s2758_s29, %s1721_s28  }
 0xd17 PF: > { %s1746_s16 = sand.u32 1, %s2346_s24   ;;  %p2831_p13 = scmp.ne.s32.totalorder %s2815_s8, 0 }
 0xd18   : > { %p2832_p0 = scmp.ge.s32.totalorder %s2358_s27, 2  ;;  %s1747_s23 = scalar_lea.sflag [#allocation4], %s1746_s16 }
 0xd1a   : > { %p2114_p5 = pnand %p2832_p0, %p2831_p13 }
 0xd1c   : > { %2341 = dma.done.wait (!%p2114_p5), %s1747_s23, 64  }
 0xd1d   : > { %2343 = vsyncadd (!%p2114_p5), %s1747_s23, 4294967232  ;;  %p21_p10 = scmp.ge.s32.totalorder %s2461_s12, 4   ;;  %s2833_s24 = smov %s2350_s25 }
 0xd1e   : > { %s2834_s25 = smov %s2354_s26  ;;  %s2835_s26 = smov %s2497_s17 }
 0xd1f   : > { %s2836_s27 = smov %s2461_s12  ;;  %23 = sbr.rel (!%p21_p10) target bundleno = 6 (0x6), region = 99 }
 0xd26   :  { %1752 = vsyncpa [#allocation3], 1 }
 0xd27   :  { %1754 = vsyncpa [#allocation3 + $0x1], 1 }
 0xd28   :  { %1755 = vsyncpa [#allocation6], 1 }
 0xd29   :  { %1756 = vsyncpa [#allocation4], 1 }
 0xd2a   :  { %1758 = vsyncpa [#allocation4 + $0x1], 1 }

</bundles_post_ra>
